<compile_context>
chip_gen: v7x
topology: tpu7x:2x2x1
jax: 0.10.0
libtpu: 0.0.40
codegen_flags: <defaults>
</compile_context>

<pallas_src>
import functools

import jax
import jax.numpy as jnp
from jax.experimental import pallas as pl
from jax.experimental.pallas import tpu as pltpu

_LANES = 128


def _dual_tensorcore():
    """True on chips where the 'parallel' grid axis shards across 2 TensorCores."""
    try:
        kind = jax.devices()[0].device_kind.lower()
    except Exception:
        return False
    return any(t in kind for t in ("v4", "v5p", "v5 p", "v7", "7x"))


def _focal_loss_kernel(pred_ref, gt_ref, out_ref, *, rows, need_mask):
    # out_ref: (8,128) f32 block, VMEM-resident across the inner ("arbitrary")
    # axis because its block index only depends on the parallel axis.
    j = pl.program_id(1)

    @pl.when(j == 0)
    def _():
        out_ref[...] = jnp.zeros_like(out_ref)

    pred = pred_ref[...].astype(jnp.float32)
    gt = gt_ref[...].astype(jnp.float32)

    # gt == 1 and gt < 1 are mutually exclusive (gt <= 1 contract), so select
    # a single log argument / weight per element: one log on the EUP.
    pos = gt == 1.0
    one_m_gt = 1.0 - gt
    w2 = one_m_gt * one_m_gt
    neg_w4 = w2 * w2                          # (1 - gt)^4
    base = jnp.where(pos, 1.0 - pred, pred)   # pos: 1-pred ; neg: pred
    w = base * base                           # pos: (1-pred)^2 ; neg: pred^2
    w = jnp.where(pos, w, w * neg_w4)
    contrib = jnp.log(1.0 - base) * w         # pos: log(pred)*... ; neg: log(1-pred)*...

    if need_mask:
        # Rows at/after `rows` are either duplicated (clamped block index) or
        # overhang garbage; zero them.  (tr,1) iota broadcast along lanes.
        tr = pred_ref.shape[0]
        p = pl.program_id(0)
        inner = pl.num_programs(1)
        start = (p * inner + j) * tr
        row_ids = start + jax.lax.broadcasted_iota(jnp.int32, (tr, 1), 0)
        contrib = jnp.where(row_ids < rows, contrib, 0.0)

    # Reduce the (tr,128) tile to (8,128) with vreg-wise VPU adds only; the
    # single cross-lane reduce happens once in the JAX wrapper.
    tr = contrib.shape[0]
    out_ref[...] += contrib.reshape(tr // 8, 8, _LANES).sum(axis=0)


def focal_loss(pred, gt, *, tile_rows=8192, num_parallel=None):
    """pred, gt: same shape (any, e.g. NCHW), any float dtype. Returns f32 scalar."""
    assert pred.shape == gt.shape
    n = int(pred.size)
    assert n > 0

    if num_parallel is None:
        num_parallel = 2 if _dual_tensorcore() else 1

    itemsize = jnp.dtype(pred.dtype).itemsize
    sub = {4: 8, 2: 16, 1: 32}.get(itemsize, 8)   # sublane quantum per dtype
    quantum = sub * _LANES

    pred_f = pred.reshape(-1)
    gt_f = gt.reshape(-1)

    # Minimal padding: only up to the next sub*128-element boundary (<= 4 KiB),
    # and only for awkward sizes.  pred=gt=1 contributes exactly 0 to the loss.
    n_pad = ((n + quantum - 1) // quantum) * quantum
    if n_pad != n:
        pad = n_pad - n
        pred_f = jnp.concatenate([pred_f, jnp.ones((pad,), pred_f.dtype)])
        gt_f = jnp.concatenate([gt_f, jnp.ones((pad,), gt_f.dtype)])

    rows = n_pad // _LANES                        # multiple of `sub`
    pred2 = pred_f.reshape(rows, _LANES)
    gt2 = gt_f.reshape(rows, _LANES)

    # Don't use more parallel chunks than there are minimum-size tiles.
    num_parallel = max(1, min(int(num_parallel), rows // sub))

    # Decouple tile size from padding: pick inner step count first, then the
    # smallest sub-multiple tile that covers the rows.
    tile_rows = max(sub, (int(tile_rows) // sub) * sub)
    inner = pl.cdiv(rows, num_parallel * tile_rows)
    tr = ((pl.cdiv(rows, num_parallel * inner) + sub - 1) // sub) * sub
    tr = min(tr, rows)                            # tr is a multiple of sub <= rows

    n_blocks = pl.cdiv(rows, tr)
    last_block = n_blocks - 1
    coverage = num_parallel * inner * tr
    need_mask = coverage != rows                  # partial last block or extra steps

    if need_mask:
        # Clamp so no block ever *starts* out of bounds; extra/overhang rows
        # are zeroed in-kernel by the row mask.
        in_idx = lambda p, j: (jnp.minimum(p * inner + j, last_block), 0)
    else:
        in_idx = lambda p, j: (p * inner + j, 0)

    kernel = functools.partial(_focal_loss_kernel, rows=rows, need_mask=need_mask)

    out_rows = num_parallel * 8
    cost = pl.CostEstimate(
        flops=12 * n,
        transcendentals=n,
        bytes_accessed=2 * rows * _LANES * itemsize + out_rows * _LANES * 4,
    )

    partials = pl.pallas_call(
        kernel,
        out_shape=jax.ShapeDtypeStruct((out_rows, _LANES), jnp.float32),
        grid_spec=pltpu.PrefetchScalarGridSpec(
            num_scalar_prefetch=0,
            grid=(num_parallel, inner),
            in_specs=[
                pl.BlockSpec((tr, _LANES), in_idx),
                pl.BlockSpec((tr, _LANES), in_idx),
            ],
            out_specs=pl.BlockSpec((8, _LANES), lambda p, j: (p, 0)),
        ),
        compiler_params=pltpu.CompilerParams(
            dimension_semantics=("parallel", "arbitrary"),
            vmem_limit_bytes=48 * 1024 * 1024,
        ),
        cost_estimate=cost,
    )(pred2, gt2)

    return -(jnp.sum(partials) / jnp.float32(n))


def _reference_focal_loss(pred, gt):
    pred = pred.astype(jnp.float32)
    gt = gt.astype(jnp.float32)
    pos_inds = (gt == 1.0).astype(jnp.float32)
    neg_inds = (gt < 1.0).astype(jnp.float32)
    neg_weights = (1.0 - gt) ** 4
    pos_loss = jnp.log(pred) * (1.0 - pred) ** 2 * pos_inds
    neg_loss = jnp.log(1.0 - pred) * pred ** 2 * neg_weights * neg_inds
    return -(jnp.mean(pos_loss) + jnp.mean(neg_loss))


def _make_inputs(key, shape):
    k1, k2, k3 = jax.random.split(key, 3)
    # pred: output of a sigmoid-like head, strictly in (0, 1)
    pred = jax.nn.sigmoid(jax.random.normal(k1, shape, jnp.float32))
    # gt: gaussian heatmap in [0, 1] with a few exact 1.0 peaks
    gt = jax.random.uniform(k2, shape, jnp.float32, 0.0, 0.99)
    peak_mask = jax.random.uniform(k3, shape) > 0.97
    gt = jnp.where(peak_mask, 1.0, gt)
    return pred, gt


if __name__ == "__main__":
    key = jax.random.PRNGKey(0)
    k_main, k_odd = jax.random.split(key, 2)

    # Primary check: NCHW shape like the PyTorch module's inputs (divides evenly).
    pred, gt = _make_inputs(k_main, (2, 4, 16, 16))
    loss = jax.block_until_ready(focal_loss(pred, gt))
    ref = _reference_focal_loss(pred, gt)
    assert jnp.allclose(loss, ref, rtol=1e-5, atol=1e-5), (loss, ref)

    # Secondary check: awkward size + forced 2-way parallel split exercises the
    # lane-padding, clamped index_map and in-kernel tail mask paths.
    pred2, gt2 = _make_inputs(k_odd, (2, 4, 16, 18))
    loss2 = jax.block_until_ready(focal_loss(pred2, gt2, num_parallel=2))
    ref2 = _reference_focal_loss(pred2, gt2)
    assert jnp.allclose(loss2, ref2, rtol=1e-5, atol=1e-5), (loss2, ref2)

    print("KERNEL_OK")
</pallas_src>

<mosaic_0001>
module attributes {stable_mosaic.version = 11 : i64} {
  func.func @_focal_loss_kernel(%arg0: i32, %arg1: i32, %arg2: memref<16x128xf32, #tpu.memory_space<vmem>>, %arg3: memref<16x128xf32, #tpu.memory_space<vmem>>, %arg4: memref<8x128xf32, #tpu.memory_space<vmem>>) attributes {dimension_semantics = [#tpu.dimension_semantics<parallel>, #tpu.dimension_semantics<arbitrary>], iteration_bounds = array<i64: 1, 1>, scalar_prefetch = 0 : i64, scratch_operands = 0 : i64, tpu.core_type = #tpu.core_type<tc>, window_params = [{transform_indices = @transform_0, window_bounds = array<i64: 16, 128>}, {transform_indices = @transform_1, window_bounds = array<i64: 16, 128>}, {transform_indices = @transform_2, window_bounds = array<i64: 8, 128>}]} {
    %c0_i32 = arith.constant 0 : i32
    %0 = arith.cmpi eq, %arg1, %c0_i32 : i32
    %1 = arith.extui %0 : i1 to i32
    %c0_i32_0 = arith.constant 0 : i32
    %2 = arith.cmpi ne, %1, %c0_i32_0 : i32
    scf.if %2 {
      %cst_12 = arith.constant 0.000000e+00 : f32
      %26 = vector.broadcast %cst_12 : f32 to vector<8x128xf32>
      %c0_13 = arith.constant 0 : index
      %c0_14 = arith.constant 0 : index
      %27 = vector.load %arg4[%c0_13, %c0_14] : memref<8x128xf32, #tpu.memory_space<vmem>>, vector<8x128xf32>
      tpu.vector_store %arg4[%c0_13, %c0_14], %26 {strides = array<i32>} : memref<8x128xf32, #tpu.memory_space<vmem>>, vector<8x128xf32>,
    } else {
    }
    %c0 = arith.constant 0 : index
    %c0_1 = arith.constant 0 : index
    %3 = vector.load %arg2[%c0, %c0_1] : memref<16x128xf32, #tpu.memory_space<vmem>>, vector<16x128xf32>
    %c0_2 = arith.constant 0 : index
    %c0_3 = arith.constant 0 : index
    %4 = vector.load %arg3[%c0_2, %c0_3] : memref<16x128xf32, #tpu.memory_space<vmem>>, vector<16x128xf32>
    %cst = arith.constant 1.000000e+00 : f32
    %5 = vector.broadcast %cst : f32 to vector<16x128xf32>
    %6 = arith.cmpf oeq, %4, %5 : vector<16x128xf32>
    %cst_4 = arith.constant 1.000000e+00 : f32
    %7 = vector.broadcast %cst_4 : f32 to vector<16x128xf32>
    %8 = arith.subf %7, %4 : vector<16x128xf32>
    %9 = arith.mulf %8, %8 : vector<16x128xf32>
    %10 = arith.mulf %9, %9 : vector<16x128xf32>
    %cst_5 = arith.constant 1.000000e+00 : f32
    %11 = vector.broadcast %cst_5 : f32 to vector<16x128xf32>
    %12 = arith.subf %11, %3 : vector<16x128xf32>
    %13 = arith.select %6, %12, %3 : vector<16x128xi1>, vector<16x128xf32>
    %14 = arith.mulf %13, %13 : vector<16x128xf32>
    %15 = arith.mulf %14, %10 : vector<16x128xf32>
    %16 = arith.select %6, %14, %15 : vector<16x128xi1>, vector<16x128xf32>
    %cst_6 = arith.constant 1.000000e+00 : f32
    %17 = vector.broadcast %cst_6 : f32 to vector<16x128xf32>
    %18 = arith.subf %17, %13 : vector<16x128xf32>
    %19 = math.log %18 : vector<16x128xf32>
    %20 = arith.mulf %19, %16 : vector<16x128xf32>
    %c0_7 = arith.constant 0 : index
    %c0_8 = arith.constant 0 : index
    %21 = vector.load %arg4[%c0_7, %c0_8] : memref<8x128xf32, #tpu.memory_space<vmem>>, vector<8x128xf32>
    %22 = vector.shape_cast %20 : vector<16x128xf32> to vector<2x8x128xf32>
    %cst_9 = arith.constant dense<0.000000e+00> : vector<8x128xf32>
    %23 = vector.multi_reduction <add>, %22, %cst_9 [0] : vector<2x8x128xf32> to vector<8x128xf32>
    %24 = arith.addf %21, %23 : vector<8x128xf32>
    %c0_10 = arith.constant 0 : index
    %c0_11 = arith.constant 0 : index
    %25 = vector.load %arg4[%c0_10, %c0_11] : memref<8x128xf32, #tpu.memory_space<vmem>>, vector<8x128xf32>
    tpu.vector_store %arg4[%c0_10, %c0_11], %24 {strides = array<i32>} : memref<8x128xf32, #tpu.memory_space<vmem>>, vector<8x128xf32>,
    return
  }
  func.func @transform_0(%arg0: i32, %arg1: i32) -> (i32, i32) {
    %c1_i32 = arith.constant 1 : i32
    %0 = arith.muli %arg0, %c1_i32 : i32
    %1 = arith.addi %0, %arg1 : i32
    %c0_i32 = arith.constant 0 : i32
    %c0_i32_0 = arith.constant 0 : i32
    return %1, %c0_i32 : i32, i32
  }
  func.func @transform_1(%arg0: i32, %arg1: i32) -> (i32, i32) {
    %c1_i32 = arith.constant 1 : i32
    %0 = arith.muli %arg0, %c1_i32 : i32
    %1 = arith.addi %0, %arg1 : i32
    %c0_i32 = arith.constant 0 : i32
    %c0_i32_0 = arith.constant 0 : i32
    return %1, %c0_i32 : i32, i32
  }
  func.func @transform_2(%arg0: i32, %arg1: i32) -> (i32, i32) {
    %c0_i32 = arith.constant 0 : i32
    %c0_i32_0 = arith.constant 0 : i32
    return %arg0, %c0_i32 : i32, i32
  }
}

</mosaic_0001>

<bundles_post_ra>
// kernel: tpu_custom_call.1
= control target key start
LH: loop header
LB: loop body
LE: loop exit
PB: predicated region body
PF: predicated region fallthrough
CT: control target
= control target key end

     0   :  { %7 = vsyncpa [#allocation3], 0  ;;  %s249_s0 = inlined_call_operand.hbm [shape: f32[16,128], index: 0, kind: input, shape index: {}]   ;;  %s250_s1 = inlined_call_operand.hbm [shape: f32[16,128], index: 1, kind: input, shape index: {}]   ;;  %s251_s2 = inlined_call_operand.hbm [shape: f32[8,128], index: 2, kind: output, shape index: {}]  }
   0x1   :  { %8 = vsyncpa [#allocation6], 0 }
   0x2   :  { %9 = vsyncpa [#allocation4], 0  ;;  %s189_s9 = smov [#allocation2]   ;;  %s117_s13 = scalar_lea.hbm %s249_s0, 256 }
   0x3   :  { %s19_s10 = sshll.u32 %s189_s9, 4  ;;  %p118_p0 = scmp.ne.s32.totalorder %s249_s0, %s117_s13  ;;  %s20_s10 = int_to_ptr.vmem [resolvable:$true] %s19_s10 }
   0x4   :  { %p121_p1 = scmp.lt.u32.totalorder %s117_s13, %s249_s0 }
   0x6   :  { %p123_p2 = pnand %p121_p1, %p118_p0 }
   0x8   :  { %126 = shalt.err (!%p123_p2)
}
   0x9   :  { %s127_s18 = scalar_lea.vmem %s20_s10, 256  ;;  %p132_p4 = scmp.lt.s32.totalorder %s20_s10, %s20_s10 }
   0xa   :  { %p128_p3 = scmp.ne.s32.totalorder %s20_s10, %s127_s18  ;;  %p133_p5 = scmp.lt.s32.totalorder %s127_s18, %s127_s18 }
   0xc   :  { %p134_p6 = por %p133_p5, %p132_p4 }
   0xe   :  { %p135_p7 = pnand %p134_p6, %p128_p3 }
  0x10   :  { %138 = shalt.err (!%p135_p7)
}
  0x11   :  { %s190_s19 = smov 128   ;;  %s191_s20 = smov 8  }
  0x12   :  { %25 = dma.hbm_to_vmem [thread:$0]  %s249_s0, 256, %s20_s10, [#allocation3], %s190_s19, %s190_s19, %s191_s20  }
  0x13   :  { %s192_s23 = smov [#allocation5]   ;;  %s139_s27 = scalar_lea.hbm %s250_s1, 256 }
  0x14   :  { %s35_s24 = sshll.u32 %s192_s23, 4  ;;  %p140_p8 = scmp.ne.s32.totalorder %s250_s1, %s139_s27  ;;  %s36_s24 = int_to_ptr.vmem [resolvable:$true] %s35_s24 }
  0x15   :  { %p143_p9 = scmp.lt.u32.totalorder %s139_s27, %s250_s1 }
  0x17   :  { %p145_p10 = pnand %p143_p9, %p140_p8 }
  0x19   :  { %148 = shalt.err (!%p145_p10)
}
  0x1a   :  { %s149_s4 = scalar_lea.vmem %s36_s24, 256  ;;  %p154_p12 = scmp.lt.s32.totalorder %s36_s24, %s36_s24 }
  0x1b   :  { %p150_p11 = scmp.ne.s32.totalorder %s36_s24, %s149_s4  ;;  %p155_p13 = scmp.lt.s32.totalorder %s149_s4, %s149_s4 }
  0x1d   :  { %p156_p0 = por %p155_p13, %p154_p12 }
  0x1f   :  { %p157_p1 = pnand %p156_p0, %p150_p11 }
  0x21   :  { %160 = shalt.err (!%p157_p1)
}
  0x22   :  { %41 = dma.hbm_to_vmem [thread:$0]  %s250_s1, 256, %s36_s24, [#allocation6], %s190_s19, %s190_s19, %s191_s20  }
  0x23   :  { %183 = dma.done.wait [#allocation3], 256  }
  0x24   :  { %184 = vsyncadd [#allocation3], 4294967040 }
  0x25   :  { %185 = dma.done.wait [#allocation6], 256  }
  0x26   :  { %186 = vsyncadd [#allocation6], 4294967040  ;;  %v57_v0 = vld [vmem:[#allocation2] sm:$0xff]  ;;  %v58_v1 = vld [vmem:[#allocation2 + $0x8] sm:$0xff]  ;;  %s193_s1 = smov [#allocation7]  }
  0x27   :  { %v59_v2 = vld [vmem:[#allocation5] sm:$0xff]  ;;  %v60_v3 = vld [vmem:[#allocation5 + $0x8] sm:$0xff]  ;;  %v69_v5 = vsub.f32 1.0, %v57_v0  ;;  %v70_v6 = vsub.f32 1.0, %v58_v1  ;;  %s97_s6 = sshll.u32 %s193_s1, 4  ;;  %s98_s6 = int_to_ptr.vmem [resolvable:$true] %s97_s6 }
  0x28   :  { %vm61_vm0 = vcmp.eq.f32.partialorder %v59_v2, 1.0  ;;  %v63_v4 = vsub.f32 1.0, %v59_v2  ;;  %vm62_vm1 = vcmp.eq.f32.partialorder %v60_v3, 1.0  ;;  %v64_v7 = vsub.f32 1.0, %v60_v3  ;;  %s161_s7 = scalar_lea.vmem %s98_s6, 128  ;;  %p166_p3 = scmp.lt.s32.totalorder %s98_s6, %s98_s6 }
  0x29   :  { %v71_v8 = vsel %vm61_vm0, %v69_v5, %v57_v0  ;;  %v72_v9 = vsel %vm62_vm1, %v70_v6, %v58_v1  ;;  %p162_p2 = scmp.ne.s32.totalorder %s98_s6, %s161_s7  ;;  %p167_p4 = scmp.lt.s32.totalorder %s161_s7, %s161_s7 }
  0x2a   :  { %v65_v10 = vmul.f32 %v63_v4, %v63_v4  ;;  %v79_v11 = vsub.f32 1.0, %v71_v8  ;;  %v66_v12 = vmul.f32 %v64_v7, %v64_v7  ;;  %v80_v13 = vsub.f32 1.0, %v72_v9 }
  0x2b   :  { %v73_v15 = vmul.f32 %v71_v8, %v71_v8  ;;  %v74_v17 = vmul.f32 %v72_v9, %v72_v9  ;;  %p168_p5 = por %p167_p4, %p166_p3 }
  0x2c   :  { %113 = vlog2.f32 %v79_v11  ;;  %v67_v14 = vmul.f32 %v65_v10, %v65_v10  ;;  %v68_v16 = vmul.f32 %v66_v12, %v66_v12 }
  0x2d   :  { %115 = vlog2.f32 %v80_v13  ;;  %p169_p6 = pnand %p168_p5, %p162_p2 }
  0x2e   :  { %v75_v18 = vmul.f32 %v73_v15, %v67_v14  ;;  %v76_v19 = vmul.f32 %v74_v17, %v68_v16 }
  0x30   :  { %v77_v21 = vsel %vm61_vm0, %v73_v15, %v75_v18  ;;  %v78_v23 = vsel %vm62_vm1, %v74_v17, %v76_v19 }
  0x36   :  { %v114_v20 = vpop.eup %113 }
  0x37   :  { %v116_v22 = vpop.eup %115  ;;  %v82_v24 = vmul.f32 0.6931472, %v114_v20 }
  0x38   :  { %v84_v25 = vmul.f32 0.6931472, %v116_v22 }
  0x39   :  { %v85_v26 = vmul.f32 %v82_v24, %v77_v21 }
  0x3a   :  { %v86_v27 = vmul.f32 %v84_v25, %v78_v23 }
  0x3c   :  { %v88_v28 = vadd.f32 %v86_v27, %v85_v26 }
  0x3e   :  { %90 = vst [vmem:[#allocation7] sm:$0xff] %v88_v28 }
  0x3f   :  { %172 = shalt.err (!%p169_p6)
}
  0x40   :  { %s173_s10 = scalar_lea.hbm %s251_s2, 128 }
  0x41   :  { %p174_p7 = scmp.ne.s32.totalorder %s251_s2, %s173_s10  ;;  %p177_p8 = scmp.lt.u32.totalorder %s173_s10, %s251_s2 }
  0x43   :  { %p179_p9 = pnand %p177_p8, %p174_p7 }
  0x45   :  { %182 = shalt.err (!%p179_p9)
}
  0x46   :  { %100 = dma.vmem_to_hbm [thread:$0]  %s98_s6, 128, %s251_s2, [#allocation4]  }
  0x47   :  { %187 = dma.done.wait [#allocation4], 128  }
  0x48   :  { %188 = vsyncadd [#allocation4], 4294967168 }
  0x49   :  { %104 = vsyncpa [#allocation3], 1 }
  0x4a   :  { %105 = vsyncpa [#allocation6], 1 }
  0x4b   :  { %106 = vsyncpa [#allocation4], 1 }

</bundles_post_ra>
